<compile_context>
chip_gen: v6e
topology: v6e:2x2x1
jax: 0.10.0
libtpu: 0.0.40
codegen_flags: <defaults>
</compile_context>

<pallas_src>
import jax
import jax.numpy as jnp
from jax import lax
from jax.experimental import pallas as pl
from jax.experimental.pallas import tpu as pltpu


def _round_up(v, m):
    return ((v + m - 1) // m) * m


def _dpredictor_kernel(x_ref, w1_ref, b1_ref, wd_ref, bd_ref, o_ref):
    # fc1 + ReLU, computed transposed so the batch sits on the lane axis:
    #   h1_t = relu(W1 @ x_tile^T + b1)  -> (ndh, block_b)
    # dot_general contracts the last dim of both operands (A . B^T) so x never
    # needs a wrapper-side transpose.
    h1 = lax.dot_general(
        w1_ref[...], x_ref[...],
        dimension_numbers=(((1,), (1,)), ((), ())),
        preferred_element_type=jnp.float32)
    h1 = jnp.maximum(h1 + b1_ref[...], 0.0)

    # fc2 folded to the single logit difference (only l1 - l0 matters for a
    # 2-class log-softmax):
    #   delta = (w2[1] - w2[0]) @ h1_t + (b2[1] - b2[0])   -> (1, block_b)
    delta = jnp.dot(wd_ref[...], h1, preferred_element_type=jnp.float32) + bd_ref[...]

    # Closed-form, numerically stable 2-class log-softmax (pure VPU/EUP work):
    #   lp1 = -softplus(-delta) = min(delta, 0) - log1p(exp(-|delta|))
    #   lp0 = lp1 - delta
    lp1 = jnp.minimum(delta, 0.0) - jnp.log1p(jnp.exp(-jnp.abs(delta)))
    lp0 = lp1 - delta

    # Lane-dense stores; two sub-ref writes avoid a sublane concat temp.
    o_ref[0:1, :] = lp0.astype(o_ref.dtype)
    o_ref[1:2, :] = lp1.astype(o_ref.dtype)


def dpredictor_forward(x, w1, b1, w2, b2, *, block_b=None, xla_fallback_batch=1024):
    """Forward pass of Dpredictor.

    x : (B, resSize)
    w1: (ndh, resSize)  -- PyTorch nn.Linear layout
    b1: (ndh,)
    w2: (2, ndh)        -- PyTorch nn.Linear layout
    b2: (2,)
    returns (B, 2) log-probabilities (LogSoftmax over dim=1).
    """
    B, res_size = x.shape
    ndh = w1.shape[0]

    # A 1-tile pallas_call still pays launch + pipeline prologue (>> the ~4K-FLOP
    # body); fused XLA wins until the batch is in the low thousands.  Passing an
    # explicit block_b forces the Pallas path.
    if block_b is None and B < xla_fallback_batch:
        return dpredictor_reference(x, w1, b1, w2, b2)

    # Batch tile: multiple of 128 (lane-dense (2, block_b) output, sublane-aligned
    # x tile).  Cap 8192: the (8192, 32) x tile pads to 128 lanes in VMEM
    # (~4 MiB x 2 buffers), safe even on v5e's 16 MiB scoped VMEM.
    cap = 8192
    if block_b is None:
        # >= 2 tiles once B >= 256 so the "parallel" batch axis shards across
        # both v7x TensorCores (no effect on single-TC v5e/v6e).
        target = _round_up(pl.cdiv(B, 2), 128) if B >= 256 else 128
        block_b = min(cap, max(128, target))
    else:
        block_b = max(128, _round_up(int(block_b), 128))
    n_tiles = pl.cdiv(B, block_b)

    # Fold fc2 into the single "delta" direction; biases as f32 columns.
    w_delta = (w2[1, :] - w2[0, :]).reshape(1, ndh)
    b_delta = jnp.reshape(b2[1] - b2[0], (1, 1)).astype(jnp.float32)
    b1_col = b1.reshape(ndh, 1).astype(jnp.float32)

    # If the producer already gives us bf16 activations, match MXU operand dtypes
    # by casting only the tiny weight matrix (no extra HBM pass over x).
    if x.dtype == jnp.bfloat16:
        w1 = w1.astype(jnp.bfloat16)
        w_delta = w_delta.astype(jnp.float32)  # epilogue / second matmul stay f32

    out_t = pl.pallas_call(
        _dpredictor_kernel,
        out_shape=jax.ShapeDtypeStruct((2, B), jnp.float32),
        grid_spec=pltpu.PrefetchScalarGridSpec(
            num_scalar_prefetch=0,
            grid=(n_tiles,),
            in_specs=[
                # x in its natural (B, resSize) layout; ragged last tile handled
                # by partial-block reads (pad columns never alias valid ones).
                pl.BlockSpec((block_b, res_size), lambda i: (i, 0)),
                # Constant-index operands: single-buffered (second pipeline
                # buffer would be pure VMEM waste; matters as resSize/ndh grow).
                pl.BlockSpec((ndh, res_size), lambda i: (0, 0),
                             pipeline_mode=pl.Buffered(1)),
                pl.BlockSpec((ndh, 1), lambda i: (0, 0),
                             pipeline_mode=pl.Buffered(1)),
                pl.BlockSpec((1, ndh), lambda i: (0, 0),
                             pipeline_mode=pl.Buffered(1)),
                pl.BlockSpec((1, 1), lambda i: (0, 0),
                             pipeline_mode=pl.Buffered(1)),
            ],
            # Lane-dense output: last dim is block_b (multiple of 128); ragged
            # tail columns are clipped by the output DMA.
            out_specs=pl.BlockSpec((2, block_b), lambda i: (0, i)),
        ),
        compiler_params=pltpu.CompilerParams(
            dimension_semantics=("parallel",),
        ),
    )(x, w1, b1_col, w_delta, b_delta)

    # Layout plumbing only: transpose the tiny (2, B) result back to (B, 2).
    return out_t.T


def dpredictor_reference(x, w1, b1, w2, b2):
    """Pure-JAX reference with PyTorch-layout weights."""
    h1 = jax.nn.relu(x @ w1.T + b1)
    return jax.nn.log_softmax(h1 @ w2.T + b2, axis=1)


def init_params(key, res_size, ndh, n_out=2):
    # PyTorch nn.Linear default init: U(-1/sqrt(fan_in), 1/sqrt(fan_in)),
    # weights stored as (out_features, in_features).
    k1, k2, k3, k4 = jax.random.split(key, 4)
    bound1 = 1.0 / jnp.sqrt(res_size)
    bound2 = 1.0 / jnp.sqrt(ndh)
    w1 = jax.random.uniform(k1, (ndh, res_size), jnp.float32, -bound1, bound1)
    b1 = jax.random.uniform(k2, (ndh,), jnp.float32, -bound1, bound1)
    w2 = jax.random.uniform(k3, (n_out, ndh), jnp.float32, -bound2, bound2)
    b2 = jax.random.uniform(k4, (n_out,), jnp.float32, -bound2, bound2)
    return w1, b1, w2, b2


if __name__ == "__main__":
    RES_SIZE, NDH = 32, 32  # opt.resSize = opt.ndh = 32

    key = jax.random.PRNGKey(0)
    kx, kx2, kp = jax.random.split(key, 3)
    w1, b1, w2, b2 = init_params(kp, RES_SIZE, NDH)

    # Aligned batch; explicit block_b forces the Pallas path and gives a
    # 2-tile grid (exercises the parallel batch axis).
    B = 256
    x = jax.random.normal(kx, (B, RES_SIZE), jnp.float32)
    out = jax.block_until_ready(dpredictor_forward(x, w1, b1, w2, b2, block_b=128))
    ref = dpredictor_reference(x, w1, b1, w2, b2)
    assert out.shape == (B, 2)
    assert jnp.allclose(out, ref, atol=1e-5, rtol=1e-5), "mismatch (aligned batch)"

    # Ragged batch: partial last input/output blocks, no jnp.pad pass over x.
    B2 = 200
    x2 = jax.random.normal(kx2, (B2, RES_SIZE), jnp.float32)
    out2 = jax.block_until_ready(dpredictor_forward(x2, w1, b1, w2, b2, block_b=128))
    ref2 = dpredictor_reference(x2, w1, b1, w2, b2)
    assert out2.shape == (B2, 2)
    assert jnp.allclose(out2, ref2, atol=1e-5, rtol=1e-5), "mismatch (ragged batch)"

    # Default sizing path (small batch -> fused-XLA fallback, same semantics).
    out3 = jax.block_until_ready(dpredictor_forward(x, w1, b1, w2, b2))
    assert out3.shape == (B, 2)
    assert jnp.allclose(out3, ref, atol=1e-6, rtol=1e-6), "mismatch (fallback path)"

    print("KERNEL_OK")
</pallas_src>

<mosaic_0001>
module attributes {stable_mosaic.version = 11 : i64} {
  func.func @_dpredictor_kernel(%arg0: i32, %arg1: memref<128x32xf32, #tpu.memory_space<vmem>>, %arg2: memref<32x32xf32, #tpu.memory_space<vmem>>, %arg3: memref<32x1xf32, #tpu.memory_space<vmem>>, %arg4: memref<1x32xf32, #tpu.memory_space<vmem>>, %arg5: memref<1x1xf32, #tpu.memory_space<vmem>>, %arg6: memref<2x128xf32, #tpu.memory_space<vmem>>) attributes {dimension_semantics = [#tpu.dimension_semantics<parallel>], iteration_bounds = array<i64: 2>, scalar_prefetch = 0 : i64, scratch_operands = 0 : i64, tpu.core_type = #tpu.core_type<tc>, window_params = [{transform_indices = @transform_0, window_bounds = array<i64: 128, 32>}, {pipeline_mode = #tpu.pipeline_mode<synchronous>, transform_indices = @transform_1, window_bounds = array<i64: 32, 32>}, {pipeline_mode = #tpu.pipeline_mode<synchronous>, transform_indices = @transform_2, window_bounds = array<i64: 32, 1>}, {pipeline_mode = #tpu.pipeline_mode<synchronous>, transform_indices = @transform_3, window_bounds = array<i64: 1, 32>}, {pipeline_mode = #tpu.pipeline_mode<synchronous>, transform_indices = @transform_4, window_bounds = array<i64: 1, 1>}, {transform_indices = @transform_5, window_bounds = array<i64: 2, 128>}]} {
    %c0 = arith.constant 0 : index
    %c0_0 = arith.constant 0 : index
    %0 = vector.load %arg2[%c0, %c0_0] : memref<32x32xf32, #tpu.memory_space<vmem>>, vector<32x32xf32>
    %c0_1 = arith.constant 0 : index
    %c0_2 = arith.constant 0 : index
    %1 = vector.load %arg1[%c0_1, %c0_2] : memref<128x32xf32, #tpu.memory_space<vmem>>, vector<128x32xf32>
    %cst = arith.constant dense<0.000000e+00> : vector<32x128xf32>
    %2 = tpu.matmul %0, %1, %cst {dimension_numbers = #tpu.dot_dimension_numbers<[1], [1], [0], [0], [0, 0, 1, 0], [], []>} : vector<32x32xf32>, vector<128x32xf32>, vector<32x128xf32> -> vector<32x128xf32>
    %c0_3 = arith.constant 0 : index
    %c0_4 = arith.constant 0 : index
    %3 = vector.load %arg3[%c0_3, %c0_4] : memref<32x1xf32, #tpu.memory_space<vmem>>, vector<32x1xf32>
    %4 = vector.broadcast %3 : vector<32x1xf32> to vector<32x128xf32>
    %5 = arith.addf %2, %4 : vector<32x128xf32>
    %cst_5 = arith.constant 0.000000e+00 : f32
    %6 = vector.broadcast %cst_5 : f32 to vector<32x128xf32>
    %7 = arith.maximumf %5, %6 : vector<32x128xf32>
    %c0_6 = arith.constant 0 : index
    %c0_7 = arith.constant 0 : index
    %8 = vector.load %arg4[%c0_6, %c0_7] : memref<1x32xf32, #tpu.memory_space<vmem>>, vector<1x32xf32>
    %cst_8 = arith.constant dense<0.000000e+00> : vector<1x128xf32>
    %9 = tpu.matmul %8, %7, %cst_8 {dimension_numbers = #tpu.dot_dimension_numbers<[1], [0], [0], [1], [0, 0, 1, 1], [], []>} : vector<1x32xf32>, vector<32x128xf32>, vector<1x128xf32> -> vector<1x128xf32>
    %c0_9 = arith.constant 0 : index
    %c0_10 = arith.constant 0 : index
    %10 = vector.load %arg5[%c0_9, %c0_10] : memref<1x1xf32, #tpu.memory_space<vmem>>, vector<1x1xf32>
    %11 = vector.broadcast %10 : vector<1x1xf32> to vector<1x128xf32>
    %12 = arith.addf %9, %11 : vector<1x128xf32>
    %cst_11 = arith.constant 0.000000e+00 : f32
    %13 = vector.broadcast %cst_11 : f32 to vector<1x128xf32>
    %14 = arith.minimumf %12, %13 : vector<1x128xf32>
    %15 = math.absf %12 : vector<1x128xf32>
    %cst_12 = arith.constant 0.000000e+00 : f32
    %16 = vector.broadcast %cst_12 : f32 to vector<1x128xf32>
    %17 = arith.subf %16, %15 : vector<1x128xf32>
    %18 = math.exp %17 : vector<1x128xf32>
    %19 = math.log1p %18 : vector<1x128xf32>
    %20 = arith.subf %14, %19 : vector<1x128xf32>
    %21 = arith.subf %20, %12 : vector<1x128xf32>
    %c0_13 = arith.constant 0 : index
    %c0_14 = arith.constant 0 : index
    %22 = vector.load %arg6[%c0_13, %c0_14] : memref<2x128xf32, #tpu.memory_space<vmem>>, vector<1x128xf32>
    tpu.vector_store %arg6[%c0_13, %c0_14], %21 {strides = array<i32>} : memref<2x128xf32, #tpu.memory_space<vmem>>, vector<1x128xf32>,
    %c1 = arith.constant 1 : index
    %c0_15 = arith.constant 0 : index
    %23 = vector.load %arg6[%c1, %c0_15] : memref<2x128xf32, #tpu.memory_space<vmem>>, vector<1x128xf32>
    tpu.vector_store %arg6[%c1, %c0_15], %20 {strides = array<i32>} : memref<2x128xf32, #tpu.memory_space<vmem>>, vector<1x128xf32>,
    return
  }
  func.func @transform_0(%arg0: i32) -> (i32, i32) {
    %c0_i32 = arith.constant 0 : i32
    %c0_i32_0 = arith.constant 0 : i32
    return %arg0, %c0_i32 : i32, i32
  }
  func.func @transform_1(%arg0: i32) -> (i32, i32) {
    %c0_i32 = arith.constant 0 : i32
    %c0_i32_0 = arith.constant 0 : i32
    %c0_i32_1 = arith.constant 0 : i32
    return %c0_i32, %c0_i32_0 : i32, i32
  }
  func.func @transform_2(%arg0: i32) -> (i32, i32) {
    %c0_i32 = arith.constant 0 : i32
    %c0_i32_0 = arith.constant 0 : i32
    %c0_i32_1 = arith.constant 0 : i32
    return %c0_i32, %c0_i32_0 : i32, i32
  }
  func.func @transform_3(%arg0: i32) -> (i32, i32) {
    %c0_i32 = arith.constant 0 : i32
    %c0_i32_0 = arith.constant 0 : i32
    %c0_i32_1 = arith.constant 0 : i32
    return %c0_i32, %c0_i32_0 : i32, i32
  }
  func.func @transform_4(%arg0: i32) -> (i32, i32) {
    %c0_i32 = arith.constant 0 : i32
    %c0_i32_0 = arith.constant 0 : i32
    %c0_i32_1 = arith.constant 0 : i32
    return %c0_i32, %c0_i32_0 : i32, i32
  }
  func.func @transform_5(%arg0: i32) -> (i32, i32) {
    %c0_i32 = arith.constant 0 : i32
    %c0_i32_0 = arith.constant 0 : i32
    return %c0_i32, %arg0 : i32, i32
  }
}

</mosaic_0001>

<bundles_post_ra>
// kernel: tpu_custom_call.1
= control target key start
LH: loop header
LB: loop body
LE: loop exit
PB: predicated region body
PF: predicated region fallthrough
CT: control target
= control target key end

     0   :  { %s1017_s0 = inlined_call_operand.vmem [shape: f32[256,32], index: 0, kind: input, shape index: {}]   ;;  %s1018_s1 = inlined_call_operand.vmem [shape: f32[32,32], index: 1, kind: input, shape index: {}]   ;;  %s1019_s2 = inlined_call_operand.vmem [shape: f32[32,1], index: 2, kind: input, shape index: {}]   ;;  %s1020_s3 = inlined_call_operand.vmem [shape: f32[1,32], index: 3, kind: input, shape index: {}]   ;;  %s1021_s4 = inlined_call_operand.<no memory space> [shape: f32[1,1], index: 4, kind: input, shape index: {}]   ;;  %s1022_s5 = inlined_call_operand.hbm [shape: f32[2,256], index: 5, kind: output, shape index: {}]  }
   0x1   :  { %v10_v0 = vstv %s1021_s4 }
   0x2   :  { %11 = vst [vmem:[#allocation2] sm:$0x1] %v10_v0 }
   0x3   :  { %12 = vsyncpa [#allocation4], 0 }
   0x4   :  { %14 = vsyncpa [#allocation4 + $0x1], 0  ;;  %s849_s20 = smov 0   ;;  %s851_s21 = smov 0  }
   0x5   :  { %s853_s22 = smov 0   ;;  %s855_s23 = smov 0  }
   0x6 LB: > { %s870_s4 = sadd.s32 4294967295, %s810_s23   ;;  %s596_s24 = sadd.s32 4294967294, %s810_s23   ;;  %s810_s23 = sphi %s855_s23, %s1028_s23   ;;  %s806_s22 = sphi %s853_s22, %s1027_s22   ;;  %s802_s21 = sphi %s851_s21, %s1026_s21   ;;  %s798_s20 = sphi %s849_s20, %s1025_s20  }
   0x7   : > { %s874_s25 = sadd.s32 1, %s810_s23   ;;  %s137_s26 = sadd.s32 1, %s806_s22 }
   0x8   : > { %s134_s27 = ssub.s32 %s810_s23, %s874_s25  ;;  %p147_p0 = scmp.ne.s32.totalorder %s806_s22, %s802_s21 }
   0x9   : > { %p135_p1 = scmp.eq.s32.totalorder %s134_s27, 0  ;;  %p148_p2 = scmp.eq.s32.totalorder %s870_s4, 1 }
   0xa   : > { %p153_p3 = scmp.ne.s32.totalorder %s802_s21, %s798_s20  ;;  %p154_p4 = scmp.eq.s32.totalorder %s596_s24, 1 }
   0xb   : > { %s885_s28 = scalar_select %p135_p1, %s806_s22, %s137_s26  }
   0xc   : > { %p887_p5 = por %p148_p2, %p147_p0  ;;  %p891_p6 = por %p154_p4, %p153_p3 }
   0xd   : > { %p599_p7 = scmp.ge.s32.totalorder %s810_s23, 1  ;;  %p193_p8 = scmp.lt.s32.totalorder %s810_s23, 3 }
   0xf   : > { %p194_p9 = pnand %p599_p7, %p193_p8 }
  0x10   : > { %s601_s6 = sshll.u32 (!%p194_p9), %s870_s4, 4  ;;  %s218_s12 = sand.u32 (!%p194_p9), 1, %s802_s21  }
  0x11   : > { %197 = sbr.rel (%p194_p9) target bundleno = 549 (0x225), region = 40  ;;  %p222_p10 = scmp.lt.s32.totalorder (!%p194_p9), %s601_s6, 31 }
  0x12   : > { %s600_s13 = sshll.u32 (!%p194_p9), %s218_s12, 1  ;;  %s625_s14 = sshll.u32 (!%p194_p9), %s870_s4, 5 }
  0x13   : > { %s220_s15 = scalar_lea.vmem (!%p194_p9), [#allocation3], %s600_s13  ;;  %s535_s19 = scalar_lea.hbm (!%p194_p9), %s1022_s5, %s625_s14 }
  0x14   : > { %s537_s16 = sshll.u32 (!%p194_p9), %s220_s15, 4  ;;  %s815_s27 = smov (!%p194_p9), [#allocation3]   ;;  %s538_s16 = int_to_ptr.vmem [resolvable:$true] %s537_s16 }
  0x15   : > { %s750_s26 = scalar_lea.vmem (!%p194_p9), %s538_s16, 32 }
  0x16   : > { %vm271_vm0 = vcmask 261120   ;;  %v227_v1 = vld [vmem:[%s1018_s1] sm:$0xff]  ;;  %v812_v2 = vmov 0   ;;  %v250_v3 = vld [vmem:[%s1019_s2 + $0x18] sm:$0xff]  ;;  %v248_v4 = vld [vmem:[%s1019_s2 + $0x8] sm:$0xff]  ;;  %s1030_s6 = smov (!%p222_p10, %s601_s6), 31  ;;  %v428_v45 = vlaneseq  ;;  %p751_p11 = scmp.ne.s32.totalorder %s538_s16, %s750_s26 }
  0x17   : > { %685 = vmatprep.mubr.msk.f32.mxu0 %vm271_vm0, %v227_v1  ;;  %744 = vset.pattern.permute.xlu0 %v812_v2  ;;  %v249_v5 = vld [vmem:[%s1019_s2 + $0x10] sm:$0xff]  ;;  %v247_v6 = vld [vmem:[%s1019_s2] sm:$0xff]  ;;  %s602_s17 = sshll.u32 %s1030_s6, 3  ;;  %v228_v24 = vld [vmem:[%s1018_s1 + $0x8] sm:$0xff]  ;;  %v813_v27 = vmov 0.0   ;;  %vm814_vm1 = vmmov 0  }
  0x18   : > { %268 = vperm.xlu0 %744, %v250_v3   ;;  %745 = vset.pattern.permute.xlu1 %v812_v2  ;;  %s917_s24 = scalar_lea.vmem %s1017_s0, %s602_s17  ;;  %v422_v9 = vld [vmem:[#allocation2] sm:$0x1]  ;;  %v229_v25 = vld [vmem:[%s1018_s1 + $0x10] sm:$0xff]  ;;  %v230_v26 = vld [vmem:[%s1018_s1 + $0x18] sm:$0xff]  ;;  %v429_v46 = vshrl.u32 %v428_v45, 7  ;;  %p752_p12 = pnand %p751_p11, %p887_p5 }
  0x19   : > { %258 = vperm.xlu1 %745, %v248_v4   ;;  %v246_v7 = vld [vmem:[%s917_s24 + $0x78] sm:$0xff]  ;;  %v245_v8 = vld [vmem:[%s917_s24 + $0x70] sm:$0xff]  ;;  %v244_v10 = vld [vmem:[%s917_s24 + $0x68] sm:$0xff]  ;;  %691 = vmatprep.subr.mxu1 %v813_v27  ;;  %s754_s6 = sshll.u32 %s815_s27, 4  ;;  %s755_s6 = int_to_ptr.vmem [resolvable:$false] %s754_s6 }
  0x1a   : > { %653 = vmatprep.subr.msk.mxu0 %vm271_vm0, %v246_v7  ;;  %v243_v11 = vld [vmem:[%s917_s24 + $0x60] sm:$0xff]  ;;  %v242_v12 = vld [vmem:[%s917_s24 + $0x58] sm:$0xff]  ;;  %v241_v13 = vld [vmem:[%s917_s24 + $0x50] sm:$0xff]  ;;  %699 = vmatprep.mubr.msk.f32.mxu1 %vm814_vm1, %v813_v27  ;;  %v430_v47 = vsub.s32 0, %v429_v46  ;;  %p753_p13 = pneg %p752_p12  ;;  %s756_s4 = scalar_lea.vmem %s755_s6, 64 }
  0x1b   : > { %654 = vmatpush3.xpose.msk.msra.mxu0 %vm271_vm0, %v246_v7  ;;  %v240_v14 = vld [vmem:[%s917_s24 + $0x48] sm:$0xff]  ;;  %v239_v15 = vld [vmem:[%s917_s24 + $0x40] sm:$0xff]  ;;  %v238_v16 = vld [vmem:[%s917_s24 + $0x38] sm:$0xff]  ;;  %p757_p0 = scmp.lt.s32.totalorder %s538_s16, %s755_s6  ;;  %p758_p1 = scmp.lt.s32.totalorder %s756_s4, %s750_s26 }
  0x1c   : > { %263 = vperm.xlu0 %744, %v249_v5   ;;  %655 = vmatprep.subr.msk.mxu0 %vm271_vm0, %v245_v8  ;;  %v237_v17 = vld [vmem:[%s917_s24 + $0x30] sm:$0xff]  ;;  %v236_v18 = vld [vmem:[%s917_s24 + $0x28] sm:$0xff]  ;;  %v235_v19 = vld [vmem:[%s917_s24 + $0x20] sm:$0xff] }
  0x1d   : > { %253 = vperm.xlu1 %745, %v247_v6   ;;  %v234_v20 = vld [vmem:[%s917_s24 + $0x18] sm:$0xff]  ;;  %v233_v21 = vld [vmem:[%s917_s24 + $0x10] sm:$0xff]  ;;  %v232_v22 = vld [vmem:[%s917_s24 + $0x8] sm:$0xff]  ;;  %p759_p2 = por %p758_p1, %p757_p0 }
  0x1e   : > { %v231_v23 = vld [vmem:[%s917_s24] sm:$0xff]  ;;  %s524_s24 = scalar_lea.sflag [#allocation4], %s218_s12 }
  0x1f   : > { %656 = vmatpush3.xpose.msk.msra.mxu0 %vm271_vm0, %v245_v8  ;;  %v421_v44 = vld [vmem:[%s1020_s3] sm:$0x1]  ;;  %p760_p3 = pnand %p759_p2, %p753_p13 }
  0x20   : > { %425 = vperm.xlu0 %744, %v422_v9   ;;  %657 = vmatprep.subr.msk.mxu0 %vm271_vm0, %v244_v10 }
  0x23   : > { %658 = vmatpush3.xpose.msk.msra.mxu0 %vm271_vm0, %v244_v10 }
  0x24   : > { %659 = vmatprep.subr.msk.mxu0 %vm271_vm0, %v243_v11 }
  0x27   : > { %660 = vmatpush3.xpose.msk.msra.mxu0 %vm271_vm0, %v243_v11 }
  0x28   : > { %661 = vmatprep.subr.msk.mxu0 %vm271_vm0, %v242_v12 }
  0x2b   : > { %662 = vmatpush3.xpose.msk.msra.mxu0 %vm271_vm0, %v242_v12 }
  0x2c   : > { %663 = vmatprep.subr.msk.mxu0 %vm271_vm0, %v241_v13 }
  0x2f   : > { %664 = vmatpush3.xpose.msk.msra.mxu0 %vm271_vm0, %v241_v13 }
  0x30   : > { %665 = vmatprep.subr.msk.mxu0 %vm271_vm0, %v240_v14 }
  0x33   : > { %666 = vmatpush3.xpose.msk.msra.mxu0 %vm271_vm0, %v240_v14 }
  0x34   : > { %667 = vmatprep.subr.msk.mxu0 %vm271_vm0, %v239_v15 }
  0x37   : > { %668 = vmatpush3.xpose.msk.msra.mxu0 %vm271_vm0, %v239_v15 }
  0x38   : > { %669 = vmatprep.subr.msk.mxu0 %vm271_vm0, %v238_v16 }
  0x3b   : > { %670 = vmatpush3.xpose.msk.msra.mxu0 %vm271_vm0, %v238_v16 }
  0x3c   : > { %671 = vmatprep.subr.msk.mxu0 %vm271_vm0, %v237_v17 }
  0x3f   : > { %672 = vmatpush3.xpose.msk.msra.mxu0 %vm271_vm0, %v237_v17 }
  0x40   : > { %673 = vmatprep.subr.msk.mxu0 %vm271_vm0, %v236_v18 }
  0x43   : > { %674 = vmatpush3.xpose.msk.msra.mxu0 %vm271_vm0, %v236_v18 }
  0x44   : > { %675 = vmatprep.subr.msk.mxu0 %vm271_vm0, %v235_v19 }
  0x47   : > { %676 = vmatpush3.xpose.msk.msra.mxu0 %vm271_vm0, %v235_v19 }
  0x48   : > { %677 = vmatprep.subr.msk.mxu0 %vm271_vm0, %v234_v20 }
  0x4b   : > { %678 = vmatpush3.xpose.msk.msra.mxu0 %vm271_vm0, %v234_v20 }
  0x4c   : > { %679 = vmatprep.subr.msk.mxu0 %vm271_vm0, %v233_v21 }
  0x4f   : > { %680 = vmatpush3.xpose.msk.msra.mxu0 %vm271_vm0, %v233_v21 }
  0x50   : > { %681 = vmatprep.subr.msk.mxu0 %vm271_vm0, %v232_v22 }
  0x53   : > { %682 = vmatpush3.xpose.msk.msra.mxu0 %vm271_vm0, %v232_v22 }
  0x54   : > { %683 = vmatprep.subr.msk.mxu0 %vm271_vm0, %v231_v23 }
  0x57   : > { %684 = vmatpush3.xpose.msk.msra.mxu0 %vm271_vm0, %v231_v23 }
  0x5a   : > { %686 = vmatmul.mubr.msk.f32.vlgmr.msra.gmra.mxu0 %vm271_vm0, %v228_v24 }
  0x5b   : > { %688 = vmatprep.mubr.msk.f32.mxu0 %vm271_vm0, %v229_v25 }
  0x5e   : > { %689 = vmatmul.mubr.msk.f32.gmra.mxu0 %vm271_vm0, %v230_v26 }
  0x93   : > { %v269_v28 = vpop.permute.xlu0 %268 }
  0x94   : > { %v259_v29 = vpop.permute.xlu1 %258 }
  0x97   : > { %v264_v33 = vpop.permute.xlu0 %263 }
  0x98   : > { %v254_v35 = vpop.permute.xlu1 %253 }
  0x9b   : > { %v426_v48 = vpop.permute.xlu0 %425 }
  0x9c   : > { %v431_v49 = vrot.slane %v426_v48, %v430_v47 }
 0x11a   : > { %v687_v30 = vpop.f32.mrf.mxu0 }
 0x11b   : > { %v404_v37 = vadd.f32 %v687_v30, %v259_v29 }
 0x11c   : > { %v398_v31 = vpop.f32.mrf.mxu0 }
 0x11d   : > { %v399_v40 = vadd.f32 %v398_v31, %v254_v35  ;;  %v418_v42 = vmax.f32 %v404_v37, 0.0 }
 0x11e   : > { %v690_v32 = vpop.f32.mrf.mxu0 }
 0x11f   : > { %v414_v34 = vadd.f32 %v690_v32, %v269_v28  ;;  %v417_v43 = vmax.f32 %v399_v40, 0.0 }
 0x120   : > { %v408_v36 = vpop.f32.mrf.mxu0 }
 0x121   : > { %v420_v38 = vmax.f32 %v414_v34, 0.0  ;;  %v409_v39 = vadd.f32 %v408_v36, %v264_v33 }
 0x123   : > { %v419_v41 = vmax.f32 %v409_v39, 0.0  ;;  %692 = vmatpush3.msra.mxu1 %v420_v38 }
 0x124   : > { %693 = vmatprep.subr.mxu1 %v813_v27 }
 0x125   : > { %694 = vmatpush3.msra.mxu1 %v419_v41 }
 0x126   : > { %695 = vmatprep.subr.mxu1 %v813_v27 }
 0x127   : > { %696 = vmatpush3.msra.mxu1 %v418_v42 }
 0x128   : > { %697 = vmatprep.subr.mxu1 %v813_v27 }
 0x129   : > { %698 = vmatpush3.msra.mxu1 %v417_v43 }
 0x12a   : > { %700 = vmatmul.mubr.msk.f32.vlgmr.msra.gmra.mxu1 %vm271_vm0, %v421_v44 }
 0x1ea   : > { %v501_v50 = vpop.f32.mrf.mxu1 }
 0x1eb   : > { %v502_v51 = vadd.f32 %v501_v50, %v431_v49 }
 0x1ec   : > { %v701_v52 = vpop.f32.mrf.mxu1 }
 0x1ed   : > { %v506_v53 = vand.u32 2147483647, %v502_v51  ;;  %v505_v0 = vmin.f32 %v502_v51, 0.0 }
 0x1ef   : > { %v507_v54 = vsub.f32 0.0, %v506_v53 }
 0x1f1   : > { %v508_v55 = vmul.f32 1.442695, %v507_v54 }
 0x1f3   : > { %746 = vpow2.f32 %v508_v55 }
 0x200   : > { %v747_v56 = vpop.eup %746 }
 0x201   : > { %v510_v57 = vadd.f32 1.0, %v747_v56  ;;  %v513_v58 = vmul.f32 -0.5, %v747_v56  ;;  %v516_v60 = vand.u32 2147483647, %v747_v56 }
 0x203   : > { %748 = vlog2.f32 %v510_v57  ;;  %v514_v59 = vadd.f32 1.0, %v513_v58  ;;  %vm517_vm2 = vcmp.lt.f32.partialorder %v516_v60, 0.0004427343 }
 0x205   : > { %v515_v63 = vmul.f32 %v747_v56, %v514_v59 }
 0x210   : > { %v749_v61 = vpop.eup %748 }
 0x211   : > { %v512_v62 = vmul.f32 0.6931472, %v749_v61 }
 0x213   : > { %v518_v1 = vsel %vm517_vm2, %v515_v63, %v512_v62 }
 0x214   : > { %v519_v2 = vsub.f32 %v505_v0, %v518_v1 }
 0x216   : > { %v520_v3 = vsub.f32 %v519_v2, %v502_v51  ;;  %522 = vst [vmem:[%s220_s15 + $0x1] sm:$0x1] %v519_v2 }
 0x218   : > { %521 = vst [vmem:[%s220_s15] sm:$0x1] %v520_v3 }
 0x219   : > { %763 = shalt.err (!%p760_p3)
}
 0x21a   : > { %s764_s7 = scalar_lea.hbm %s535_s19, 32  ;;  %s768_s10 = scalar_lea.hbm %s1022_s5, 64 }
 0x21b   : > { %p765_p4 = scmp.ne.s32.totalorder %s535_s19, %s764_s7  ;;  %p769_p9 = scmp.lt.s32.totalorder %s535_s19, %s1022_s5 }
 0x21c   : > { %p770_p10 = scmp.lt.s32.totalorder %s768_s10, %s764_s7 }
 0x21d   : > { %p766_p7 = pnand %p765_p4, %p887_p5 }
 0x21e   : > { %p771_p11 = por %p770_p10, %p769_p9 }
 0x21f   : > { %p767_p8 = pneg %p766_p7 }
 0x221   : > { %p772_p12 = pnand %p771_p11, %p767_p8 }
 0x223   : > { %775 = shalt.err (!%p772_p12)
}
 0x224   : > { %702 = dma.vmem_to_hbm [thread:$0]  (%p887_p5), %s538_s16, 32, %s535_s19, %s524_s24  }
 0x225 PF: > { %p708_p13 = scmp.ge.s32.totalorder %s810_s23, 2  ;;  %s549_s13 = sand.u32 1, %s798_s20  }
 0x226   : > { %s550_s14 = scalar_lea.sflag [#allocation4], %s549_s13 }
 0x227   : > { %p705_p0 = pnand %p708_p13, %p891_p6 }
 0x229   : > { %p706_p1 = pneg %p705_p0 }
 0x22b   : > { %793 = dma.done.wait (%p706_p1), %s550_s14, 32  }
 0x22c   : > { %795 = vsyncadd (%p706_p1), %s550_s14, 4294967264  ;;  %p17_p2 = scmp.ge.s32.totalorder %s874_s25, 4   ;;  %s1025_s20 = smov %s802_s21 }
 0x22d   : > { %s1026_s21 = smov %s806_s22  ;;  %s1027_s22 = smov %s885_s28 }
 0x22e   : > { %s1028_s23 = smov %s874_s25  ;;  %19 = sbr.rel (!%p17_p2) target bundleno = 6 (0x6), region = 75 }
 0x233   :  { %555 = vsyncpa [#allocation4], 1 }
 0x234   :  { %557 = vsyncpa [#allocation4 + $0x1], 1 }

</bundles_post_ra>
